<compile_context>
chip_gen: v5e
topology: v5e:2x2
jax: 0.10.0
libtpu: 0.0.40
codegen_flags: <defaults>
</compile_context>

<pallas_src>
import functools

import numpy as np
import jax
import jax.numpy as jnp
from jax.experimental import pallas as pl
from jax.experimental.pallas import tpu as pltpu


def _bilinear_matrix(out_size: int, in_size: int) -> np.ndarray:
    """1-D linear interpolation matrix matching torch interpolate align_corners=True."""
    if out_size == 1:
        src = np.zeros((1,), dtype=np.float64)
    else:
        src = np.arange(out_size, dtype=np.float64) * (in_size - 1) / (out_size - 1)
    lo = np.clip(np.floor(src).astype(np.int64), 0, in_size - 1)
    hi = np.minimum(lo + 1, in_size - 1)
    w_hi = (src - lo).astype(np.float32)
    w_lo = (1.0 - w_hi).astype(np.float32)
    m = np.zeros((out_size, in_size), dtype=np.float32)
    np.add.at(m, (np.arange(out_size), lo), w_lo)
    np.add.at(m, (np.arange(out_size), hi), w_hi)
    return m


def _add_pe_kernel(mv_ref, pe_ref, out_ref):
    # mv_ref/out_ref: (G, hw, C) tile of fused (batch*view) slabs.
    # pe_ref:         (hw, C) interpolated positional encoding (constant block).
    out_ref[...] = (mv_ref[...] + pe_ref[...][None]).astype(out_ref.dtype)


def _choose_group(n_groups: int, hw: int, c: int, itemsize: int,
                  target_bytes: int = 2 << 20) -> int:
    """Largest divisor of n_groups whose tile (G, hw, C) stays <= ~2 MiB.

    2 MiB per buffer keeps double-buffered mv+out (+PE) under ~10 MiB, safely
    within the scoped-VMEM defaults on v5e/v6e/v7x while still being large
    enough to amortize per-grid-step overhead.
    """
    per_group = hw * c * itemsize
    best = 1
    for g in range(1, n_groups + 1):
        if n_groups % g == 0 and g * per_group <= target_bytes:
            best = g
    return best


@functools.lru_cache(maxsize=None)
def _build_add_pe_call(n_groups: int, group: int, hw: int, c: int, dtype_str: str):
    dtype = jnp.dtype(dtype_str)
    call = pl.pallas_call(
        _add_pe_kernel,
        out_shape=jax.ShapeDtypeStruct((n_groups, hw, c), dtype),
        grid_spec=pltpu.PrefetchScalarGridSpec(
            num_scalar_prefetch=0,
            grid=(n_groups // group,),
            in_specs=[
                pl.BlockSpec((group, hw, c), lambda g: (g, 0, 0)),
                pl.BlockSpec((hw, c), lambda g: (0, 0)),
            ],
            out_specs=pl.BlockSpec((group, hw, c), lambda g: (g, 0, 0)),
        ),
        # Pure streaming add with no carried state -> embarrassingly parallel;
        # on v7x this shards the grid across both TensorCores.
        compiler_params=pltpu.CompilerParams(
            dimension_semantics=("parallel",)),
    )
    return jax.jit(call)


class MultiViewPosionalEmbeddings:
    """JAX/Pallas port of the PyTorch module (forward pass only)."""

    def __init__(self, positional_encoding_h, positional_encoding_w,
                 interpolate_mode="bilinear", req_grad=True,
                 patch_size=14, hidden_size=384, key=None):
        self.P = patch_size
        self.C = hidden_size
        self.pe_h = positional_encoding_h
        self.pe_w = positional_encoding_w
        self.interpolate_mode = interpolate_mode
        key = jax.random.PRNGKey(0) if key is None else key
        # torch.randn(1, pe_h, pe_w, C) -> deterministic normal init.
        self.PE = jax.random.normal(
            key, (1, self.pe_h, self.pe_w, self.C), dtype=jnp.float32)
        self._pe_cache = {}   # (emb_h, emb_w) -> (emb_h*emb_w, C) PE table

    def _interpolated_pe(self, emb_h, emb_w):
        key = (emb_h, emb_w)
        if key not in self._pe_cache:
            if emb_h == self.pe_h and emb_w == self.pe_w:
                pe = self.PE.reshape(self.pe_h * self.pe_w, self.C)
            else:
                # Separable bilinear resize: a few KB of weights instead of a
                # (hw_out x hw_in) Kronecker matrix; done once in plain XLA.
                # TODO(synk): only 'bilinear' (align_corners=True) interpolation
                # is implemented; other torch modes (e.g. bicubic) are not.
                wh = jnp.asarray(_bilinear_matrix(emb_h, self.pe_h))
                ww = jnp.asarray(_bilinear_matrix(emb_w, self.pe_w))
                pe = jnp.einsum("hp,wq,pqc->hwc", wh, ww, self.PE[0],
                                precision=jax.lax.Precision.HIGHEST)
                pe = pe.reshape(emb_h * emb_w, self.C)
            self._pe_cache[key] = pe
        return self._pe_cache[key]

    def __call__(self, mv_emb, N_view, img_h, img_w):
        B, N_patch, C = mv_emb.shape
        assert C == self.C
        emb_h = img_h // self.P
        emb_w = img_w // self.P
        hw = emb_h * emb_w
        assert N_patch == N_view * hw

        # One-time interpolated PE (cached); match the embedding dtype so the
        # in-kernel add is a straight vreg-for-vreg stream (bf16 add on v6e/v7x).
        pe = self._interpolated_pe(emb_h, emb_w).astype(mv_emb.dtype)

        n_groups = B * N_view
        mv = mv_emb.reshape(n_groups, hw, C)
        group = _choose_group(n_groups, hw, C, mv.dtype.itemsize)
        call = _build_add_pe_call(n_groups, group, hw, C, str(mv.dtype))
        out = call(mv, pe)
        return out.reshape(B, N_view * hw, C)


if __name__ == "__main__":
    key = jax.random.PRNGKey(0)
    k_pe, k_emb1, k_emb2 = jax.random.split(key, 3)

    P, C, pe_h, pe_w = 4, 32, 4, 4
    B, N_view = 2, 3
    module = MultiViewPosionalEmbeddings(
        pe_h, pe_w, "bilinear", True, patch_size=P, hidden_size=C, key=k_pe)

    # Case 1: embedding grid matches PE grid -> plain broadcast add (no interp).
    img_h1 = img_w1 = P * pe_h                        # 16 -> emb 4x4
    mv1 = jax.random.normal(k_emb1, (B, N_view * 4 * 4, C), dtype=jnp.float32)
    out1 = jax.block_until_ready(module(mv1, N_view, img_h1, img_w1))

    # Case 2: different grid -> bilinear (align_corners=True) interpolation of PE.
    img_h2 = img_w2 = P * 6                           # 24 -> emb 6x6
    mv2 = jax.random.normal(k_emb2, (B, N_view * 6 * 6, C), dtype=jnp.float32)
    out2 = jax.block_until_ready(module(mv2, N_view, img_h2, img_w2))

    # Pure-JAX / numpy references.
    ref1 = (mv1.reshape(B, N_view, 4, 4, C) + module.PE).reshape(B, -1, C)
    np.testing.assert_allclose(np.asarray(out1), np.asarray(ref1),
                               rtol=1e-5, atol=1e-5)

    wh = _bilinear_matrix(6, pe_h)
    ww = _bilinear_matrix(6, pe_w)
    pe_np = np.asarray(module.PE)[0]                  # (pe_h, pe_w, C)
    pe_i = np.einsum("hp,wq,pqc->hwc", wh, ww, pe_np) # (6, 6, C)
    ref2 = (np.asarray(mv2).reshape(B, N_view, 6, 6, C)
            + pe_i[None, None]).reshape(B, -1, C)
    np.testing.assert_allclose(np.asarray(out2), ref2, rtol=1e-4, atol=1e-5)

    print("KERNEL_OK")
</pallas_src>

<mosaic_0001>
module attributes {stable_mosaic.version = 11 : i64} {
  func.func @_add_pe_kernel(%arg0: i32, %arg1: memref<6x16x32xf32, #tpu.memory_space<vmem>>, %arg2: memref<16x32xf32, #tpu.memory_space<vmem>>, %arg3: memref<6x16x32xf32, #tpu.memory_space<vmem>>) attributes {dimension_semantics = [#tpu.dimension_semantics<parallel>], iteration_bounds = array<i64: 1>, scalar_prefetch = 0 : i64, scratch_operands = 0 : i64, tpu.core_type = #tpu.core_type<tc>, window_params = [{transform_indices = @transform_0, window_bounds = array<i64: 6, 16, 32>}, {pipeline_mode = #tpu.pipeline_mode<synchronous>, transform_indices = @transform_1, window_bounds = array<i64: 16, 32>}, {transform_indices = @transform_2, window_bounds = array<i64: 6, 16, 32>}]} {
    %c0 = arith.constant 0 : index
    %c0_0 = arith.constant 0 : index
    %c0_1 = arith.constant 0 : index
    %0 = vector.load %arg1[%c0, %c0_0, %c0_1] : memref<6x16x32xf32, #tpu.memory_space<vmem>>, vector<6x16x32xf32>
    %c0_2 = arith.constant 0 : index
    %c0_3 = arith.constant 0 : index
    %1 = vector.load %arg2[%c0_2, %c0_3] : memref<16x32xf32, #tpu.memory_space<vmem>>, vector<16x32xf32>
    %2 = vector.shape_cast %1 : vector<16x32xf32> to vector<1x16x32xf32>
    %3 = vector.broadcast %2 : vector<1x16x32xf32> to vector<6x16x32xf32>
    %4 = arith.addf %0, %3 : vector<6x16x32xf32>
    %c0_4 = arith.constant 0 : index
    %c0_5 = arith.constant 0 : index
    %c0_6 = arith.constant 0 : index
    %5 = vector.load %arg3[%c0_4, %c0_5, %c0_6] : memref<6x16x32xf32, #tpu.memory_space<vmem>>, vector<6x16x32xf32>
    tpu.vector_store %arg3[%c0_4, %c0_5, %c0_6], %4 {strides = array<i32>} : memref<6x16x32xf32, #tpu.memory_space<vmem>>, vector<6x16x32xf32>,
    return
  }
  func.func @transform_0(%arg0: i32) -> (i32, i32, i32) {
    %c0_i32 = arith.constant 0 : i32
    %c0_i32_0 = arith.constant 0 : i32
    %c0_i32_1 = arith.constant 0 : i32
    return %arg0, %c0_i32, %c0_i32_0 : i32, i32, i32
  }
  func.func @transform_1(%arg0: i32) -> (i32, i32) {
    %c0_i32 = arith.constant 0 : i32
    %c0_i32_0 = arith.constant 0 : i32
    %c0_i32_1 = arith.constant 0 : i32
    return %c0_i32, %c0_i32_0 : i32, i32
  }
  func.func @transform_2(%arg0: i32) -> (i32, i32, i32) {
    %c0_i32 = arith.constant 0 : i32
    %c0_i32_0 = arith.constant 0 : i32
    %c0_i32_1 = arith.constant 0 : i32
    return %arg0, %c0_i32, %c0_i32_0 : i32, i32, i32
  }
}

</mosaic_0001>

<bundles_post_ra>
// kernel: tpu_custom_call.1
= control target key start
LH: loop header
LB: loop body
LE: loop exit
PB: predicated region body
PF: predicated region fallthrough
CT: control target
= control target key end

     0   :  { %7 = vsyncpa [#allocation3], 0  ;;  %s236_s0 = inlined_call_operand.hbm [shape: f32[6,16,32], index: 0, kind: input, shape index: {}]   ;;  %s237_s1 = inlined_call_operand.hbm [shape: f32[16,32], index: 1, kind: input, shape index: {}]   ;;  %s238_s2 = inlined_call_operand.hbm [shape: f32[6,16,32], index: 2, kind: output, shape index: {}]  }
   0x1   :  { %8 = vsyncpa [#allocation6], 0 }
   0x2   :  { %9 = vsyncpa [#allocation4], 0  ;;  %s14_s11 = sshll.u32 %s236_s0, 4  ;;  %s186_s12 = smov [#allocation2]   ;;  %s15_s11 = int_to_ptr.hbm [resolvable:$true] %s14_s11 }
   0x3   :  { %s16_s13 = sshll.u32 %s186_s12, 4  ;;  %s27_s16 = sshll.u32 %s237_s1, 4  ;;  %s17_s13 = int_to_ptr.vmem [resolvable:$true] %s16_s13  ;;  %s28_s16 = int_to_ptr.hbm [resolvable:$true] %s27_s16 }
   0x4   :  { %s187_s17 = smov 128   ;;  %s188_s18 = smov 8  }
   0x5   :  { %22 = dma.hbm_to_vmem [thread:$0]  %s15_s11, 1536, %s17_s13, [#allocation3], %s187_s17, %s187_s17, %s188_s18  }
   0x6   :  { %s189_s19 = smov [#allocation5]  }
   0x7   :  { %s29_s20 = sshll.u32 %s189_s19, 4  ;;  %s30_s20 = int_to_ptr.vmem [resolvable:$true] %s29_s20 }
   0x8   :  { %35 = dma.hbm_to_vmem [thread:$0]  %s28_s16, 256, %s30_s20, [#allocation6], %s187_s17, %s187_s17, %s188_s18  }
   0x9   :  { %180 = dma.done.wait [#allocation3], 1536  }
   0xa   :  { %181 = vsyncadd [#allocation3], 4294965760 }
   0xb   :  { %182 = dma.done.wait [#allocation6], 256  }
   0xc   :  { %183 = vsyncadd [#allocation6], 4294967040  ;;  %v44_v0 = vld [vmem:[#allocation2] sm:$0xff]  ;;  %vm70_vm0 = vcmask 261120   ;;  %v45_v2 = vld [vmem:[#allocation2 + $0x8] sm:$0xff]  ;;  %s190_s0 = smov [#allocation7]  }
   0xd   :  { %v56_v1 = vld [vmem:[#allocation5] sm:$0xff]  ;;  %v57_v4 = vld [vmem:[#allocation5 + $0x8] sm:$0xff]  ;;  %v46_v5 = vld [vmem:[#allocation2 + $0x10] sm:$0xff]  ;;  %s87_s1 = sshll.u32 %s190_s0, 4  ;;  %s89_s23 = sshll.u32 %s238_s2, 4  ;;  %s88_s1 = int_to_ptr.vmem [resolvable:$true] %s87_s1  ;;  %s90_s23 = int_to_ptr.hbm [resolvable:$true] %s89_s23 }
   0xe   :  { %v58_v3 = vadd.f32 %v56_v1, %v44_v0  ;;  %v47_v6 = vld [vmem:[#allocation2 + $0x18] sm:$0xff]  ;;  %v59_v7 = vadd.f32 %v57_v4, %v45_v2  ;;  %v60_v8 = vadd.f32 %v56_v1, %v46_v5  ;;  %v48_v10 = vld [vmem:[#allocation2 + $0x20] sm:$0xff]  ;;  %v49_v11 = vld [vmem:[#allocation2 + $0x28] sm:$0xff] }
   0xf   :  { %v61_v9 = vadd.f32 %v57_v4, %v47_v6  ;;  %v50_v12 = vld [vmem:[#allocation2 + $0x30] sm:$0xff]  ;;  %v62_v13 = vadd.f32 %v56_v1, %v48_v10  ;;  %v51_v14 = vld [vmem:[#allocation2 + $0x38] sm:$0xff]  ;;  %v63_v15 = vadd.f32 %v57_v4, %v49_v11  ;;  %v52_v16 = vld [vmem:[#allocation2 + $0x40] sm:$0xff] }
  0x10   :  { %71 = vst.msk [vmem:[#allocation7] sm:$0xff] %vm70_vm0, %v58_v3  ;;  %v64_v17 = vadd.f32 %v56_v1, %v50_v12  ;;  %v53_v18 = vld [vmem:[#allocation2 + $0x48] sm:$0xff]  ;;  %v65_v19 = vadd.f32 %v57_v4, %v51_v14  ;;  %v54_v20 = vld [vmem:[#allocation2 + $0x50] sm:$0xff]  ;;  %v66_v21 = vadd.f32 %v56_v1, %v52_v16  ;;  %v55_v22 = vld [vmem:[#allocation2 + $0x58] sm:$0xff] }
  0x11   :  { %72 = vst.msk [vmem:[#allocation7 + $0x8] sm:$0xff] %vm70_vm0, %v59_v7  ;;  %v67_v23 = vadd.f32 %v57_v4, %v53_v18  ;;  %v68_v24 = vadd.f32 %v56_v1, %v54_v20  ;;  %v69_v25 = vadd.f32 %v57_v4, %v55_v22 }
  0x12   :  { %73 = vst.msk [vmem:[#allocation7 + $0x10] sm:$0xff] %vm70_vm0, %v60_v8 }
  0x13   :  { %74 = vst.msk [vmem:[#allocation7 + $0x18] sm:$0xff] %vm70_vm0, %v61_v9 }
  0x14   :  { %75 = vst.msk [vmem:[#allocation7 + $0x20] sm:$0xff] %vm70_vm0, %v62_v13 }
  0x15   :  { %76 = vst.msk [vmem:[#allocation7 + $0x28] sm:$0xff] %vm70_vm0, %v63_v15 }
  0x16   :  { %77 = vst.msk [vmem:[#allocation7 + $0x30] sm:$0xff] %vm70_vm0, %v64_v17 }
  0x17   :  { %78 = vst.msk [vmem:[#allocation7 + $0x38] sm:$0xff] %vm70_vm0, %v65_v19 }
  0x18   :  { %79 = vst.msk [vmem:[#allocation7 + $0x40] sm:$0xff] %vm70_vm0, %v66_v21 }
  0x19   :  { %80 = vst.msk [vmem:[#allocation7 + $0x48] sm:$0xff] %vm70_vm0, %v67_v23 }
  0x1a   :  { %81 = vst.msk [vmem:[#allocation7 + $0x50] sm:$0xff] %vm70_vm0, %v68_v24 }
  0x1b   :  { %82 = vst.msk [vmem:[#allocation7 + $0x58] sm:$0xff] %vm70_vm0, %v69_v25 }
  0x1c   :  { %95 = dma.vmem_to_hbm [thread:$0]  %s88_s1, 1536, %s90_s23, [#allocation4], %s187_s17, %s187_s17, %s188_s18  }
  0x1d   :  { %184 = dma.done.wait [#allocation4], 1536  }
  0x1e   :  { %185 = vsyncadd [#allocation4], 4294965760 }
  0x1f   :  { %100 = vsyncpa [#allocation3], 1 }
  0x20   :  { %101 = vsyncpa [#allocation6], 1 }
  0x21   :  { %102 = vsyncpa [#allocation4], 1 }

</bundles_post_ra>
